<compile_context>
chip_gen: v7x
topology: tpu7x:2x2x1
jax: 0.10.0
libtpu: 0.0.40
codegen_flags: <defaults>
</compile_context>

<pallas_src>
import jax
import jax.numpy as jnp
from jax.experimental import pallas as pl
from jax.experimental.pallas import tpu as pltpu

IMG_K = 28 * 28          # 784  (full last dim of the image operand; Mosaic pads layout internally)
HID = 128
OUT_PAD = 128            # fused (mu | logvar) head padded to 128 output lanes
EMB_ROWS = 16            # 10 classes padded to 16 table rows (sublane friendly)


def _round_up(x, m):
    return (x + m - 1) // m * m


def encoder_kernel(lbl_ref, img_ref, w_img_ref, emb_tbl_ref,
                   w_head_ref, b_head_ref, out_ref):
    tb = lbl_ref.shape[0]

    # Main matmul: fp32 image is cast to bf16 in-kernel (cheap VPU convert hidden
    # under the DMA/MXU), fp32 accumulation on the MXU.
    img_bf16 = img_ref[...].astype(jnp.bfloat16)                      # (TB, 784) bf16
    hid = jnp.dot(img_bf16, w_img_ref[...],
                  preferred_element_type=jnp.float32)                 # (TB, 128) f32

    # Label contribution (table already folds in b_hid): one-hot gather via a tiny
    # (TB, 16) @ (16, 128) bf16 matmul on the precomputed table (0/1 one-hot is exact
    # in bf16; table precision loss is far inside tolerance).
    oh = (jax.lax.broadcasted_iota(jnp.int32, (tb, EMB_ROWS), 1)
          == lbl_ref[...]).astype(jnp.bfloat16)                       # (TB, 16)
    hid = hid + jnp.dot(oh, emb_tbl_ref[...],
                        preferred_element_type=jnp.float32)

    hid = jnp.maximum(hid, 0.0)                                       # fp32 elementwise

    # Fused mu|logvar heads: bf16 operands, fp32 accumulation, lane-dense (TB, 128)
    # fp32 output -> unmasked stores.
    out_ref[...] = (jnp.dot(hid.astype(jnp.bfloat16), w_head_ref[...],
                            preferred_element_type=jnp.float32)
                    + b_head_ref[...])


def init_params(key, latent_dim=3, num_classes=10):
    ks = jax.random.split(key, 8)

    def lin(kw, kb, fan_in, fan_out):
        # deterministic uniform init (same spirit as PyTorch's default Linear init)
        bound = 1.0 / jnp.sqrt(fan_in)
        w = jax.random.uniform(kw, (fan_in, fan_out), jnp.float32, -bound, bound)
        b = jax.random.uniform(kb, (fan_out,), jnp.float32, -bound, bound)
        return w, b

    w_emb, b_emb = lin(ks[0], ks[1], num_classes, 16)
    w_hid, b_hid = lin(ks[2], ks[3], IMG_K + 16, HID)
    w_mu, b_mu = lin(ks[4], ks[5], HID, latent_dim)
    w_lv, b_lv = lin(ks[6], ks[7], HID, latent_dim)
    return dict(w_emb=w_emb, b_emb=b_emb, w_hid=w_hid, b_hid=b_hid,
                w_mu=w_mu, b_mu=b_mu, w_lv=w_lv, b_lv=b_lv)


def encoder_forward(params, image, label, latent_dim=3, num_classes=10,
                    tile_b=None):
    assert 2 * latent_dim <= OUT_PAD, "fused mu|logvar head must fit in 128 lanes"
    B = image.shape[0]

    # Batch tile: large tiles amortize the ~0.35us per-grid-step overhead of this
    # HBM-bound kernel (review: 1024 reaches ~85-90% of roofline).  Keep the grid
    # length >= 2 so dimension_semantics=("parallel",) can shard across v7x's 2 TCs.
    if tile_b is None:
        tile_b = min(1024, max(8, _round_up(pl.cdiv(B, 2), 8)))
    tile_b = max(8, _round_up(tile_b, 8))
    B_pad = _round_up(B, tile_b)

    # ---- activations (no padded bf16 copy: fp32 image streams straight in) ----
    img_flat = image.reshape(B, -1).astype(jnp.float32)               # (B, 784) fp32
    if B_pad != B:
        img_flat = jnp.pad(img_flat, ((0, B_pad - B), (0, 0)))
    lbl = label.astype(jnp.int32)
    if B_pad != B:
        lbl = jnp.pad(lbl, (0, B_pad - B))
    lbl = lbl.reshape(B_pad, 1)

    # ---- weights (prepared once in the wrapper; layout plumbing only) ----
    # image part of fc_hidden, bf16 for the MXU (fp32 accumulation).
    w_img = params["w_hid"][:IMG_K, :].astype(jnp.bfloat16)           # (784, 128)

    # label-embedding lookup table: relu(W_emb[c] + b_emb) @ W_hid_emb + b_hid
    emb_all = jax.nn.relu(params["w_emb"] + params["b_emb"][None, :])            # (10, 16)
    tbl = emb_all @ params["w_hid"][IMG_K:, :] + params["b_hid"][None, :]         # (10, 128)
    tbl = jnp.pad(tbl, ((0, EMB_ROWS - num_classes), (0, 0))).astype(jnp.bfloat16)  # (16, 128)

    # fused mu|logvar head, padded to 128 output lanes, bf16 operands.
    w_head = jnp.concatenate([params["w_mu"], params["w_lv"]], axis=1)            # (128, 2L)
    w_head = jnp.pad(w_head, ((0, 0), (0, OUT_PAD - 2 * latent_dim)))
    w_head = w_head.astype(jnp.bfloat16)                                          # (128, 128)
    b_head = jnp.concatenate([params["b_mu"], params["b_lv"]])
    b_head = jnp.pad(b_head, (0, OUT_PAD - 2 * latent_dim)).reshape(1, OUT_PAD)   # fp32

    grid = (B_pad // tile_b,)

    flops = 2 * B_pad * (IMG_K * HID + EMB_ROWS * HID + HID * OUT_PAD)
    bytes_accessed = (B_pad * IMG_K * 4 + B_pad * 4           # image fp32 + labels
                      + IMG_K * HID * 2 + EMB_ROWS * HID * 2  # resident weights
                      + HID * OUT_PAD * 2 + OUT_PAD * 4
                      + B_pad * OUT_PAD * 4)                  # fused head output

    # VMEM budget: double-buffered streaming inputs/outputs + resident weights +
    # fp32 intermediates.  Only raise the scoped limit when the estimate approaches
    # v5e's 16 MiB default (cap at 48 MiB to stay under v7x's 64 MiB physical VMEM).
    weights_bytes = IMG_K * HID * 2 + EMB_ROWS * HID * 2 + HID * OUT_PAD * 2 + OUT_PAD * 4
    stream_bytes = 2 * (tile_b * IMG_K * 4 + tile_b * OUT_PAD * 4 + tile_b * 4)
    vmem_est = weights_bytes + stream_bytes + 4 * tile_b * HID * 4
    compiler_kwargs = dict(dimension_semantics=("parallel",))
    if vmem_est > 12 * (1 << 20):
        compiler_kwargs["vmem_limit_bytes"] = min(int(vmem_est * 3 // 2), 48 * (1 << 20))

    out = pl.pallas_call(
        encoder_kernel,
        out_shape=jax.ShapeDtypeStruct((B_pad, OUT_PAD), jnp.float32),
        grid=grid,
        in_specs=[
            pl.BlockSpec((tile_b, 1), lambda i: (i, 0)),        # labels
            pl.BlockSpec((tile_b, IMG_K), lambda i: (i, 0)),    # image tile (fp32, full 784 lanes)
            pl.BlockSpec((IMG_K, HID), lambda i: (0, 0)),       # w_img (resident)
            pl.BlockSpec((EMB_ROWS, HID), lambda i: (0, 0)),    # emb table (resident)
            pl.BlockSpec((HID, OUT_PAD), lambda i: (0, 0)),     # fused head W (resident)
            pl.BlockSpec((1, OUT_PAD), lambda i: (0, 0)),       # fused head b (resident)
        ],
        out_specs=pl.BlockSpec((tile_b, OUT_PAD), lambda i: (i, 0)),
        compiler_params=pltpu.CompilerParams(**compiler_kwargs),
        cost_estimate=pl.CostEstimate(flops=flops, transcendentals=0,
                                      bytes_accessed=bytes_accessed),
    )(lbl, img_flat, w_img, tbl, w_head, b_head)

    head = out[:B]
    mu = head[:, :latent_dim]
    logvar = head[:, latent_dim:2 * latent_dim]
    return mu, logvar


def encoder_forward_ref(params, image, label, num_classes=10):
    B = image.shape[0]
    img_flat = image.reshape(B, -1).astype(jnp.float32)
    oh = jax.nn.one_hot(label, num_classes, dtype=jnp.float32)
    emb = jax.nn.relu(oh @ params["w_emb"] + params["b_emb"])
    cat = jnp.concatenate([img_flat, emb], axis=1)
    hid = jax.nn.relu(cat @ params["w_hid"] + params["b_hid"])
    mu = hid @ params["w_mu"] + params["b_mu"]
    logvar = hid @ params["w_lv"] + params["b_lv"]
    return mu, logvar


if __name__ == "__main__":
    key = jax.random.PRNGKey(0)
    kp, ki, kl = jax.random.split(key, 3)

    params = init_params(kp, latent_dim=3, num_classes=10)

    B = 13  # deliberately not a multiple of the tile to exercise batch padding
    image = jax.random.normal(ki, (B, 1, 28, 28), jnp.float32)   # NCHW like PyTorch
    label = jax.random.randint(kl, (B,), 0, 10, jnp.int32)

    # tile_b=8 with B=13 -> B_pad=16, grid=(2,): exercises the pipelined batch grid.
    mu, logvar = encoder_forward(params, image, label, tile_b=8)
    jax.block_until_ready((mu, logvar))

    # Also exercise the default large-tile path (grid >= 2, tile rounded to 8).
    mu_d, logvar_d = encoder_forward(params, image, label)
    jax.block_until_ready((mu_d, logvar_d))

    mu_ref, lv_ref = encoder_forward_ref(params, image, label)
    # bf16 MXU operands (fp32 accumulation) on the 784-wide and head matmuls
    # -> loosened tolerance.
    assert jnp.allclose(mu, mu_ref, atol=2e-2, rtol=2e-2)
    assert jnp.allclose(logvar, lv_ref, atol=2e-2, rtol=2e-2)
    assert jnp.allclose(mu_d, mu_ref, atol=2e-2, rtol=2e-2)
    assert jnp.allclose(logvar_d, lv_ref, atol=2e-2, rtol=2e-2)

    print("KERNEL_OK")
</pallas_src>

<mosaic_0001>
module attributes {stable_mosaic.version = 11 : i64} {
  func.func @encoder_kernel(%arg0: i32, %arg1: memref<8x1xi32, #tpu.memory_space<vmem>>, %arg2: memref<8x784xf32, #tpu.memory_space<vmem>>, %arg3: memref<784x128xbf16, #tpu.memory_space<vmem>>, %arg4: memref<16x128xbf16, #tpu.memory_space<vmem>>, %arg5: memref<128x128xbf16, #tpu.memory_space<vmem>>, %arg6: memref<1x128xf32, #tpu.memory_space<vmem>>, %arg7: memref<8x128xf32, #tpu.memory_space<vmem>>) attributes {dimension_semantics = [#tpu.dimension_semantics<parallel>], iteration_bounds = array<i64: 2>, scalar_prefetch = 0 : i64, scratch_operands = 0 : i64, tpu.core_type = #tpu.core_type<tc>, window_params = [{transform_indices = @transform_0, window_bounds = array<i64: 8, 1>}, {transform_indices = @transform_1, window_bounds = array<i64: 8, 784>}, {pipeline_mode = #tpu.pipeline_mode<synchronous>, transform_indices = @transform_2, window_bounds = array<i64: 784, 128>}, {pipeline_mode = #tpu.pipeline_mode<synchronous>, transform_indices = @transform_3, window_bounds = array<i64: 16, 128>}, {pipeline_mode = #tpu.pipeline_mode<synchronous>, transform_indices = @transform_4, window_bounds = array<i64: 128, 128>}, {pipeline_mode = #tpu.pipeline_mode<synchronous>, transform_indices = @transform_5, window_bounds = array<i64: 1, 128>}, {transform_indices = @transform_6, window_bounds = array<i64: 8, 128>}]} {
    %c0 = arith.constant 0 : index
    %c0_0 = arith.constant 0 : index
    %0 = vector.load %arg2[%c0, %c0_0] : memref<8x784xf32, #tpu.memory_space<vmem>>, vector<8x784xf32>
    %1 = arith.truncf %0 : vector<8x784xf32> to vector<8x784xbf16>
    %c0_1 = arith.constant 0 : index
    %c0_2 = arith.constant 0 : index
    %2 = vector.load %arg3[%c0_1, %c0_2] : memref<784x128xbf16, #tpu.memory_space<vmem>>, vector<784x128xbf16>
    %cst = arith.constant dense<0.000000e+00> : vector<8x128xf32>
    %3 = tpu.matmul %1, %2, %cst {dimension_numbers = #tpu.dot_dimension_numbers<[1], [0], [0], [1], [0, 0, 1, 1], [], []>} : vector<8x784xbf16>, vector<784x128xbf16>, vector<8x128xf32> -> vector<8x128xf32>
    %4 = tpu.iota {dimensions = array<i32: 1>} : vector<8x16xi32>
    %c0_3 = arith.constant 0 : index
    %c0_4 = arith.constant 0 : index
    %5 = vector.load %arg1[%c0_3, %c0_4] : memref<8x1xi32, #tpu.memory_space<vmem>>, vector<8x1xi32>
    %6 = vector.broadcast %5 : vector<8x1xi32> to vector<8x16xi32>
    %7 = arith.cmpi eq, %4, %6 : vector<8x16xi32>
    %8 = arith.extui %7 : vector<8x16xi1> to vector<8x16xi32>
    %9 = arith.sitofp %8 : vector<8x16xi32> to vector<8x16xf32>
    %10 = arith.truncf %9 : vector<8x16xf32> to vector<8x16xbf16>
    %c0_5 = arith.constant 0 : index
    %c0_6 = arith.constant 0 : index
    %11 = vector.load %arg4[%c0_5, %c0_6] : memref<16x128xbf16, #tpu.memory_space<vmem>>, vector<16x128xbf16>
    %cst_7 = arith.constant dense<0.000000e+00> : vector<8x128xf32>
    %12 = tpu.matmul %10, %11, %cst_7 {dimension_numbers = #tpu.dot_dimension_numbers<[1], [0], [0], [1], [0, 0, 1, 1], [], []>} : vector<8x16xbf16>, vector<16x128xbf16>, vector<8x128xf32> -> vector<8x128xf32>
    %13 = arith.addf %3, %12 : vector<8x128xf32>
    %cst_8 = arith.constant 0.000000e+00 : f32
    %14 = vector.broadcast %cst_8 : f32 to vector<8x128xf32>
    %15 = arith.maximumf %13, %14 : vector<8x128xf32>
    %16 = arith.truncf %15 : vector<8x128xf32> to vector<8x128xbf16>
    %c0_9 = arith.constant 0 : index
    %c0_10 = arith.constant 0 : index
    %17 = vector.load %arg5[%c0_9, %c0_10] : memref<128x128xbf16, #tpu.memory_space<vmem>>, vector<128x128xbf16>
    %cst_11 = arith.constant dense<0.000000e+00> : vector<8x128xf32>
    %18 = tpu.matmul %16, %17, %cst_11 {dimension_numbers = #tpu.dot_dimension_numbers<[1], [0], [0], [1], [0, 0, 1, 1], [], []>} : vector<8x128xbf16>, vector<128x128xbf16>, vector<8x128xf32> -> vector<8x128xf32>
    %c0_12 = arith.constant 0 : index
    %c0_13 = arith.constant 0 : index
    %19 = vector.load %arg6[%c0_12, %c0_13] : memref<1x128xf32, #tpu.memory_space<vmem>>, vector<1x128xf32>
    %20 = vector.broadcast %19 : vector<1x128xf32> to vector<8x128xf32>
    %21 = arith.addf %18, %20 : vector<8x128xf32>
    %c0_14 = arith.constant 0 : index
    %c0_15 = arith.constant 0 : index
    %22 = vector.load %arg7[%c0_14, %c0_15] : memref<8x128xf32, #tpu.memory_space<vmem>>, vector<8x128xf32>
    tpu.vector_store %arg7[%c0_14, %c0_15], %21 {strides = array<i32>} : memref<8x128xf32, #tpu.memory_space<vmem>>, vector<8x128xf32>,
    return
  }
  func.func @transform_0(%arg0: i32) -> (i32, i32) {
    %c0_i32 = arith.constant 0 : i32
    %c0_i32_0 = arith.constant 0 : i32
    return %arg0, %c0_i32 : i32, i32
  }
  func.func @transform_1(%arg0: i32) -> (i32, i32) {
    %c0_i32 = arith.constant 0 : i32
    %c0_i32_0 = arith.constant 0 : i32
    return %arg0, %c0_i32 : i32, i32
  }
  func.func @transform_2(%arg0: i32) -> (i32, i32) {
    %c0_i32 = arith.constant 0 : i32
    %c0_i32_0 = arith.constant 0 : i32
    %c0_i32_1 = arith.constant 0 : i32
    return %c0_i32, %c0_i32_0 : i32, i32
  }
  func.func @transform_3(%arg0: i32) -> (i32, i32) {
    %c0_i32 = arith.constant 0 : i32
    %c0_i32_0 = arith.constant 0 : i32
    %c0_i32_1 = arith.constant 0 : i32
    return %c0_i32, %c0_i32_0 : i32, i32
  }
  func.func @transform_4(%arg0: i32) -> (i32, i32) {
    %c0_i32 = arith.constant 0 : i32
    %c0_i32_0 = arith.constant 0 : i32
    %c0_i32_1 = arith.constant 0 : i32
    return %c0_i32, %c0_i32_0 : i32, i32
  }
  func.func @transform_5(%arg0: i32) -> (i32, i32) {
    %c0_i32 = arith.constant 0 : i32
    %c0_i32_0 = arith.constant 0 : i32
    %c0_i32_1 = arith.constant 0 : i32
    return %c0_i32, %c0_i32_0 : i32, i32
  }
  func.func @transform_6(%arg0: i32) -> (i32, i32) {
    %c0_i32 = arith.constant 0 : i32
    %c0_i32_0 = arith.constant 0 : i32
    return %arg0, %c0_i32 : i32, i32
  }
}

</mosaic_0001>

<bundles_post_ra>
// kernel: tpu_custom_call.1
= control target key start
LH: loop header
LB: loop body
LE: loop exit
PB: predicated region body
PF: predicated region fallthrough
CT: control target
= control target key end

     0   :  { %11 = vsyncpa [#allocation3], 0  ;;  %s1970_s0 = inlined_call_operand.vmem [shape: s32[16,1], index: 0, kind: input, shape index: {}]   ;;  %s1971_s1 = inlined_call_operand.hbm [shape: f32[16,784], index: 1, kind: input, shape index: {}]   ;;  %s1972_s2 = inlined_call_operand.hbm [shape: bf16[784,128], index: 2, kind: input, shape index: {}]   ;;  %s1973_s3 = inlined_call_operand.vmem [shape: bf16[16,128], index: 3, kind: input, shape index: {}]   ;;  %s1974_s4 = inlined_call_operand.hbm [shape: bf16[128,128], index: 4, kind: input, shape index: {}]   ;;  %s1975_s5 = inlined_call_operand.vmem [shape: f32[1,128], index: 5, kind: input, shape index: {}]   ;;  %s1976_s6 = inlined_call_operand.hbm [shape: f32[16,128], index: 6, kind: output, shape index: {}]  }
   0x1   :  { %13 = vsyncpa [#allocation3 + $0x1], 0 }
   0x2   :  { %14 = vsyncpa [#allocation6], 0 }
   0x3   :  { %15 = vsyncpa [#allocation4], 0 }
   0x4   :  { %17 = vsyncpa [#allocation4 + $0x1], 0  ;;  %s1703_s21 = smov 0   ;;  %s1705_s22 = smov 0  }
   0x5   :  { %s1707_s23 = smov 0   ;;  %s1709_s24 = smov 0  }
   0x6 LB: > { %s1724_s25 = sadd.s32 4294967295, %s1657_s24   ;;  %s1175_s26 = sadd.s32 4294967294, %s1657_s24   ;;  %s1657_s24 = sphi %s1709_s24, %s1996_s24   ;;  %s1653_s23 = sphi %s1707_s23, %s1995_s23   ;;  %s1649_s22 = sphi %s1705_s22, %s1994_s22   ;;  %s1645_s21 = sphi %s1703_s21, %s1993_s21  }
   0x7   : > { %p69_p0 = scmp.ne.s32.totalorder %s1649_s22, %s1645_s21  ;;  %p1977_p1 = scmp.eq.s32.totalorder %s1724_s25, 0 }
   0x8   : > { %p183_p3 = scmp.eq.s32.totalorder %s1175_s26, 1  ;;  %p1176_p5 = scmp.ge.s32.totalorder %s1657_s24, 1 }
   0x9   : > { %p1733_p4 = por %p1977_p1, %p69_p0  ;;  %p190_p7 = scmp.lt.s32.totalorder %s1657_s24, 3 }
   0xa   : > { %p1738_p6 = por %p183_p3, %p69_p0  ;;  %s1659_s30 = smov [#allocation5]  }
   0xb   : > { %s1980_s27 = scalar_select %p1733_p4, 1, 0 }
   0xc   : > { %s1981_s28 = scalar_select %p1738_p6, 1, 0 }
   0xd   : > { %p1743_p8 = pnand %p1176_p5, %p190_p7  ;;  %s202_s7 = sshll.u32 %s1659_s30, 4  ;;  %s1747_s7 = int_to_ptr.vmem [resolvable:$true] %s202_s7 }
   0xe   : > { %s1660_s9 = smov [#allocation7]   ;;  %s1501_s13 = scalar_lea.hbm %s1972_s2, 6272 }
   0xf   : > { %p1382_p9 = pneg %p1743_p8  ;;  %s218_s10 = sshll.u32 %s1660_s9, 4  ;;  %s1758_s10 = int_to_ptr.vmem [resolvable:$true] %s218_s10 }
  0x10   : > { %p1502_p12 = scmp.ne.s32.totalorder %s1972_s2, %s1501_s13  ;;  %p1508_p5 = scmp.lt.u32.totalorder %s1501_s13, %s1972_s2 }
  0x11   : > { %p1754_p11 = pnand %p1382_p9, %p1977_p1 }
  0x13   : > { %p1503_p13 = pneg %p1754_p11 }
  0x15   : > { %p1504_p0 = pnand %p1503_p13, %p1502_p12 }
  0x17   : > { %p1505_p3 = pneg %p1504_p0 }
  0x19   : > { %p1510_p7 = pnand %p1508_p5, %p1505_p3 }
  0x1b   : > { %1513 = shalt.err (!%p1510_p7)
}
  0x1c   : > { %s1514_s18 = scalar_lea.vmem %s1747_s7, 6272  ;;  %p1522_p2 = scmp.lt.s32.totalorder %s1747_s7, %s1747_s7 }
  0x1d   : > { %p1515_p9 = scmp.ne.s32.totalorder %s1747_s7, %s1514_s18  ;;  %p1523_p12 = scmp.lt.s32.totalorder %s1514_s18, %s1514_s18 }
  0x1f   : > { %p1517_p10 = pnand %p1515_p9, %p1503_p13  ;;  %p1524_p0 = por %p1523_p12, %p1522_p2 }
  0x21   : > { %p1518_p1 = pneg %p1517_p10 }
  0x23   : > { %p1525_p6 = pnand %p1524_p0, %p1518_p1 }
  0x25   : > { %1528 = shalt.err (!%p1525_p6)
}
  0x26   : > { %s1661_s19 = smov 64   ;;  %s1662_s20 = smov 4  }
  0x27   : > { %1385 = dma.hbm_to_vmem [thread:$0]  (!%p1754_p11), %s1972_s2, 6272, %s1747_s7, [#allocation6], %s1661_s19, %s1661_s19, %s1662_s20  }
  0x28   : > { %s1529_s12 = scalar_lea.hbm %s1974_s4, 1024 }
  0x29   : > { %p1530_p2 = scmp.ne.s32.totalorder %s1974_s4, %s1529_s12  ;;  %p1536_p10 = scmp.lt.u32.totalorder %s1529_s12, %s1974_s4 }
  0x2b   : > { %p1532_p1 = pnand %p1530_p2, %p1503_p13 }
  0x2d   : > { %p1533_p6 = pneg %p1532_p1 }
  0x2f   : > { %p1538_p3 = pnand %p1536_p10, %p1533_p6 }
  0x31   : > { %1541 = shalt.err (!%p1538_p3)
}
  0x32   : > { %s1542_s7 = scalar_lea.vmem %s1758_s10, 1024  ;;  %p1550_p12 = scmp.lt.s32.totalorder %s1758_s10, %s1758_s10 }
  0x33   : > { %p1543_p5 = scmp.ne.s32.totalorder %s1758_s10, %s1542_s7  ;;  %p1551_p0 = scmp.lt.s32.totalorder %s1542_s7, %s1542_s7 }
  0x35   : > { %p1545_p7 = pnand %p1543_p5, %p1503_p13  ;;  %p1552_p2 = por %p1551_p0, %p1550_p12 }
  0x37   : > { %p1546_p9 = pneg %p1545_p7 }
  0x39   : > { %p1553_p1 = pnand %p1552_p2, %p1546_p9 }
  0x3b   : > { %1556 = shalt.err (!%p1553_p1)
}
  0x3c   : > { %1388 = dma.hbm_to_vmem [thread:$0]  (!%p1754_p11), %s1974_s4, 1024, %s1758_s10, [#allocation6], %s1661_s19, %s1661_s19, %s1662_s20  }
  0x3d   : > { %s1813_s26 = sadd.s32 1, %s1657_s24   ;;  %s56_s8 = sadd.s32 1, %s1653_s23 }
  0x3e   : > { %s53_s30 = ssub.s32 %s1657_s24, %s1813_s26  ;;  %p63_p13 = scmp.ne.s32.totalorder %s1653_s23, %s1649_s22 }
  0x3f   : > { %p54_p6 = scmp.eq.s32.totalorder %s53_s30, 0  ;;  %p64_p10 = scmp.eq.s32.totalorder %s1657_s24, 0 }
  0x40   : > { %p1984_p3 = scmp.eq.s32.totalorder %s1724_s25, 1  ;;  %p1399_p7 = scmp.lt.s32.totalorder %s1657_s24, 2 }
  0x41   : > { %s1829_s11 = scalar_select %p54_p6, %s1653_s23, %s56_s8  }
  0x42   : > { %p1823_p5 = por %p1984_p3, %p63_p13  ;;  %p65_p9 = por %p64_p10, %p63_p13 }
  0x43   : > { %s242_s12 = sand.u32 1, %s1653_s23   ;;  %s1368_s10 = smul.u32 896, %s1657_s24 }
  0x44   : > { %s1985_s9 = scalar_select %p1823_p5, 1, 0 }
  0x45   : > { %s1367_s13 = smul.u32 56, %s242_s12  ;;  %p1833_p11 = pnand %p1399_p7, %p65_p9 }
  0x46   : > { %s1840_s15 = scalar_lea.hbm %s1971_s1, %s1368_s10  ;;  %s243_s17 = scalar_lea.sflag [#allocation3], %s242_s12 }
  0x47   : > { %s246_s16 = scalar_lea.vmem [#allocation2], %s1367_s13  ;;  %s1557_s18 = scalar_lea.hbm %s1840_s15, 896 }
  0x48   : > { %s254_s7 = sshll.u32 %s246_s16, 4  ;;  %p1558_p12 = scmp.ne.s32.totalorder %s1840_s15, %s1557_s18  ;;  %s1842_s7 = int_to_ptr.vmem [resolvable:$true] %s254_s7 }
  0x49   : > { %p1559_p0 = pneg %p1833_p11  ;;  %s1562_s10 = scalar_lea.hbm %s1971_s1, 1792 }
  0x4a   : > { %p1563_p13 = scmp.lt.u32.totalorder %s1840_s15, %s1971_s1  ;;  %p1564_p6 = scmp.lt.u32.totalorder %s1562_s10, %s1557_s18 }
  0x4b   : > { %p1560_p2 = pnand %p1559_p0, %p1558_p12  ;;  %p1566_p3 = scmp.lt.u32.totalorder %s1557_s18, %s1840_s15 }
  0x4c   : > { %p1565_p10 = por %p1564_p6, %p1563_p13 }
  0x4d   : > { %p1561_p1 = pneg %p1560_p2 }
  0x4e   : > { %p1567_p7 = por %p1566_p3, %p1565_p10 }
  0x50   : > { %p1568_p9 = pnand %p1567_p7, %p1561_p1 }
  0x52   : > { %1571 = shalt.err (!%p1568_p9)
}
  0x53   : > { %s1572_s12 = scalar_lea.vmem %s1842_s7, 896  ;;  %s1663_s13 = smov [#allocation2]  }
  0x54   : > { %p1573_p12 = scmp.ne.s32.totalorder %s1842_s7, %s1572_s12  ;;  %s1577_s16 = sshll.u32 %s1663_s13, 4  ;;  %s1578_s16 = int_to_ptr.vmem [resolvable:$false] %s1577_s16 }
  0x55   : > { %s1579_s8 = scalar_lea.vmem %s1578_s16, 1792  ;;  %p1580_p4 = scmp.lt.s32.totalorder %s1842_s7, %s1578_s16 }
  0x56   : > { %p1575_p2 = pnand %p1573_p12, %p1559_p0  ;;  %p1581_p13 = scmp.lt.s32.totalorder %s1579_s8, %s1572_s12 }
  0x58   : > { %p1576_p5 = pneg %p1575_p2  ;;  %p1582_p6 = por %p1581_p13, %p1580_p4 }
  0x5a   : > { %p1583_p10 = pnand %p1582_p6, %p1576_p5 }
  0x5c   : > { %1586 = shalt.err (!%p1583_p10)
}
  0x5d   : > { %1392 = dma.hbm_to_vmem [thread:$0]  (!%p1833_p11), %s1840_s15, 896, %s1842_s7, %s243_s17  }
  0x5e   : > { %263 = sbr.rel (%p1743_p8) target bundleno = 759 (0x2f7), region = 44  ;;  %s1872_s18 = sand.u32 (!%p1743_p8), 1, %s1649_s22  }
  0x5f   : > { %s1369_s30 = smul.u32 (!%p1743_p8), 56, %s1872_s18  ;;  %s266_s10 = scalar_lea.sflag (!%p1743_p8), [#allocation3], %s1872_s18 }
  0x60   : > { %p1987_p4 = scmp.ne.s32.totalorder (!%p1743_p8), %s1980_s27, 0 }
  0x61   : > { %s1876_s20 = scalar_lea.vmem (!%p1743_p8), [#allocation2], %s1369_s30 }
  0x65   : > { %1632 = dma.done.wait (%p1987_p4), %s266_s10, 896  }
  0x66   : > { %1634 = vsyncadd (%p1987_p4), %s266_s10, 4294966400  ;;  %p1988_p5 = scmp.eq.s32.totalorder %s1724_s25, 0 }
  0x68   : > { %1636 = dma.done.wait (%p1988_p5), [#allocation6], 7296   ;;  %p1989_p8 = pmov %p1988_p5 }
  0x69   : > { %p310_p11 = scmp.lt.s32.totalorder %s1724_s25, 1  ;;  %v1664_v0 = vmov 0   ;;  %v1665_v1 = vmov 0.0   ;;  %v1443_v3 = vld [vmem:[%s1973_s3] sm:$0xff]   ;;  %v1444_v4 = vld [vmem:[#allocation5 + $0x40] sm:$0xff]   ;;  %vm1666_vm0 = vmmov 0   ;;  %v427_v28 = vlaneseq }
  0x6a   : > { %1638 = vsyncadd (%p1989_p8), [#allocation6], 4294960000  ;;  %1442 = vset.pattern.permute.xlu0 %v1664_v0  ;;  %1331 = vmatprep.subr.bf16.mxu1 %v1665_v1  ;;  %v1446_v5 = vld [vmem:[#allocation5 + $0xc0] sm:$0xff]   ;;  %v1450_v7 = vld [vmem:[#allocation5 + $0xc8] sm:$0xff]   ;;  %vm445_vm1 = vcmask 130048   ;;  %s1184_s12 = sshll.u32 %s1872_s18, 3 }
  0x6b   : > { %s311_s29 = scalar_select %p310_p11, %s1724_s25, 1  ;;  %1332 = vmatpush3.bf16.msra.mxu1 %v1443_v3  ;;  %1333 = vmatprep.mubr.msk.bf16.mxu1 %vm1666_vm0, %v1665_v1  ;;  %v1447_v6 = vld [vmem:[#allocation5 + $0x80] sm:$0xff]   ;;  %v1451_v8 = vld [vmem:[#allocation5 + $0x88] sm:$0xff]   ;;  %v1454_v9 = vld [vmem:[#allocation5 + $0xd0] sm:$0xff]   ;;  %v428_v29 = vand.u32 127, %v427_v28 }
  0x6c   : > { %1254 = vmatprep.subr.bf16.mxu1 %v1444_v4  ;;  %1276 = vmatprep.subr.bf16.mxu0 %v1446_v5  ;;  %v1455_v10 = vld [vmem:[#allocation5 + $0x90] sm:$0xff]   ;;  %v1458_v11 = vld [vmem:[#allocation5 + $0xd8] sm:$0xff]   ;;  %v1462_v13 = vld [vmem:[#allocation5 + $0xe0] sm:$0xff]   ;;  %s1249_s8 = sshll.u32 %s1724_s25, 7  ;;  %s309_s30 = scalar_lea.vmem [#allocation8], %s1184_s12 }
  0x6d   : > { %s1185_s19 = sshll.u32 %s311_s29, 3  ;;  %1277 = vmatpush3.bf16.msra.mxu0 %v1447_v6  ;;  %v1459_v12 = vld [vmem:[#allocation5 + $0x98] sm:$0xff]   ;;  %v1463_v14 = vld [vmem:[#allocation5 + $0xa0] sm:$0xff]   ;;  %v1466_v15 = vld [vmem:[#allocation5 + $0xe8] sm:$0xff]   ;;  %s1074_s10 = sshll.u32 %s309_s30, 4  ;;  %s1928_s10 = int_to_ptr.vmem [resolvable:$true] %s1074_s10 }
  0x6e   : > { %s313_s27 = scalar_lea.vmem %s1970_s0, %s1185_s19  ;;  %1278 = vmatprep.subr.bf16.mxu0 %v1450_v7  ;;  %v1467_v16 = vld [vmem:[#allocation5 + $0xa8] sm:$0xff]   ;;  %v1470_v17 = vld [vmem:[#allocation5 + $0xf0] sm:$0xff]   ;;  %v1474_v19 = vld [vmem:[#allocation5 + $0xf8] sm:$0xff]   ;;  %s1926_s19 = scalar_lea.hbm %s1976_s6, %s1249_s8 }
  0x6f   : > { %v429_v2 = vld [vmem:[%s313_s27] sm:$0xff]  ;;  %v1475_v20 = vld [vmem:[#allocation5 + $0xb8] sm:$0xff]   ;;  %v318_v21 = vld [vmem:[%s1876_s20 + $0x18] sm:$0xff]  ;;  %s1061_s15 = scalar_lea.sflag [#allocation4], %s1872_s18  ;;  %s1587_s25 = scalar_lea.vmem %s1928_s10, 128 }
  0x70   : > { %431 = vperm.xlu0 %1442, %v429_v2   ;;  %v1471_v18 = vld [vmem:[#allocation5 + $0xb0] sm:$0xff]   ;;  %v325_v22 = vpack.c.bf16 %v318_v21, %v318_v21  ;;  %v317_v23 = vld [vmem:[%s1876_s20 + $0x10] sm:$0xff]  ;;  %v1448_v36 = vld [vmem:[#allocation5 + $0x48] sm:$0xff]   ;;  %p1588_p0 = scmp.ne.s32.totalorder %s1928_s10, %s1587_s25  ;;  %p1990_p1 = scmp.ne.s32.totalorder %s1985_s9, 0 }
  0x71   : > { %1279 = vmatpush3.bf16.msra.mxu0 %v1451_v8  ;;  %v324_v24 = vpack.c.bf16 %v317_v23, %v317_v23  ;;  %v1492_v25 = vld [vmem:[#allocation5 + $0x180] sm:$0xff]   ;;  %v316_v30 = vld [vmem:[%s1876_s20 + $0x8] sm:$0xff]  ;;  %v1449_v37 = vld [vmem:[#allocation5 + $0x8] sm:$0xff]   ;;  %s1667_s7 = smov [#allocation8]  }
  0x72   : > { %1280 = vmatprep.subr.bf16.mxu0 %v1454_v9  ;;  %858 = vmatprep.mubr.bf16.mxu0 %v325_v22  ;;  %v321_v26 = vld [vmem:[%s1876_s20 + $0x30] sm:$0xff]  ;;  %v323_v34 = vpack.c.bf16 %v316_v30, %v316_v30  ;;  %v1452_v38 = vld [vmem:[#allocation5 + $0x50] sm:$0xff]   ;;  %v1464_v44 = vld [vmem:[#allocation5 + $0x68] sm:$0xff]   ;;  %p1589_p3 = pnand %p1588_p0, %p1990_p1  ;;  %s1591_s27 = sshll.u32 %s1667_s7, 4  ;;  %s1592_s27 = int_to_ptr.vmem [resolvable:$false] %s1591_s27 }
  0x73   : > { %v328_v27 = vpack.c.bf16 %v321_v26, %v321_v26  ;;  %v1445_v33 = vld [vmem:[#allocation5] sm:$0xff]   ;;  %v1453_v39 = vld [vmem:[#allocation5 + $0x10] sm:$0xff]   ;;  %v1456_v40 = vld [vmem:[#allocation5 + $0x58] sm:$0xff]   ;;  %s1593_s17 = scalar_lea.vmem %s1592_s27, 256  ;;  %p1594_p9 = scmp.lt.s32.totalorder %s1928_s10, %s1592_s27 }
  0x74   : > { %v1457_v41 = vld [vmem:[#allocation5 + $0x18] sm:$0xff]   ;;  %v1460_v42 = vld [vmem:[#allocation5 + $0x60] sm:$0xff]   ;;  %v1465_v45 = vld [vmem:[#allocation5 + $0x28] sm:$0xff]   ;;  %p1590_p7 = pneg %p1589_p3  ;;  %p1595_p12 = scmp.lt.s32.totalorder %s1593_s17, %s1587_s25 }
  0x75   : > { %1281 = vmatpush3.bf16.msra.mxu0 %v1455_v10  ;;  %v1461_v43 = vld [vmem:[#allocation5 + $0x20] sm:$0xff]   ;;  %v1468_v46 = vld [vmem:[#allocation5 + $0x70] sm:$0xff]   ;;  %v1472_v48 = vld [vmem:[#allocation5 + $0x78] sm:$0xff]  }
  0x76   : > { %1282 = vmatprep.subr.bf16.mxu0 %v1458_v11  ;;  %v1469_v47 = vld [vmem:[#allocation5 + $0x30] sm:$0xff]   ;;  %v1473_v49 = vld [vmem:[#allocation5 + $0x38] sm:$0xff]   ;;  %v1476_v51 = vld [vmem:[#allocation5 + $0x140] sm:$0xff]   ;;  %p1596_p2 = por %p1595_p12, %p1594_p9 }
  0x77   : > { %v315_v50 = vld [vmem:[%s1876_s20] sm:$0xff]  ;;  %v320_v52 = vld [vmem:[%s1876_s20 + $0x28] sm:$0xff]  ;;  %v1477_v54 = vld [vmem:[#allocation5 + $0x100] sm:$0xff]  }
  0x78   : > { %v322_v53 = vpack.c.bf16 %v315_v50, %v315_v50  ;;  %v327_v55 = vpack.c.bf16 %v320_v52, %v320_v52  ;;  %v1478_v56 = vld [vmem:[#allocation5 + $0x148] sm:$0xff]   ;;  %v1480_v58 = vld [vmem:[#allocation5 + $0x150] sm:$0xff]   ;;  %v1482_v60 = vld [vmem:[#allocation5 + $0x158] sm:$0xff]   ;;  %p1597_p13 = pnand %p1596_p2, %p1590_p7 }
  0x79   : > { %1283 = vmatpush3.bf16.msra.mxu0 %v1459_v12  ;;  %v1479_v57 = vld [vmem:[#allocation5 + $0x108] sm:$0xff]   ;;  %v1481_v59 = vld [vmem:[#allocation5 + $0x110] sm:$0xff]   ;;  %v1483_v61 = vld [vmem:[#allocation5 + $0x118] sm:$0xff]  }
  0x7a   : > { %1284 = vmatprep.subr.bf16.mxu0 %v1462_v13  ;;  %v1484_v62 = vld [vmem:[#allocation5 + $0x160] sm:$0xff]   ;;  %v1486_v0 = vld [vmem:[#allocation5 + $0x168] sm:$0xff]   ;;  %v1488_v3 = vld [vmem:[#allocation5 + $0x170] sm:$0xff]  }
  0x7b   : > { %v1485_v63 = vld [vmem:[#allocation5 + $0x120] sm:$0xff]   ;;  %v1487_v2 = vld [vmem:[#allocation5 + $0x128] sm:$0xff]   ;;  %v1489_v4 = vld [vmem:[#allocation5 + $0x130] sm:$0xff]  }
  0x7c   : > { %v1490_v5 = vld [vmem:[#allocation5 + $0x178] sm:$0xff]   ;;  %v319_v7 = vld [vmem:[%s1876_s20 + $0x20] sm:$0xff] }
  0x7d   : > { %1285 = vmatpush3.bf16.msra.mxu0 %v1463_v14  ;;  %v1491_v6 = vld [vmem:[#allocation5 + $0x138] sm:$0xff]   ;;  %v326_v8 = vpack.c.bf16 %v319_v7, %v319_v7  ;;  %v1493_v14 = vld [vmem:[#allocation7] sm:$0xff]  }
  0x7e   : > { %1286 = vmatprep.subr.bf16.mxu0 %v1466_v15  ;;  %v1494_v15 = vld [vmem:[#allocation7 + $0x8] sm:$0xff]   ;;  %v1499_v22 = vld [vmem:[#allocation7 + $0x30] sm:$0xff]  }
  0x81   : > { %1287 = vmatpush3.bf16.msra.mxu0 %v1467_v16  ;;  %v1495_v16 = vld [vmem:[#allocation7 + $0x10] sm:$0xff]  }
  0x82   : > { %1288 = vmatprep.subr.bf16.mxu0 %v1470_v17  ;;  %v1496_v17 = vld [vmem:[#allocation7 + $0x18] sm:$0xff]  }
  0x85   : > { %1289 = vmatpush3.bf16.msra.mxu0 %v1471_v18  ;;  %v1497_v18 = vld [vmem:[#allocation7 + $0x20] sm:$0xff]  }
  0x86   : > { %1290 = vmatprep.subr.bf16.mxu0 %v1474_v19  ;;  %v1498_v19 = vld [vmem:[#allocation7 + $0x28] sm:$0xff]  }
  0x89   : > { %1291 = vmatpush3.bf16.msra.mxu0 %v1475_v20 }
  0x8a   : > { %1337 = vmatprep.subr.bf16.mxu0 %v1665_v1 }
  0x8c   : > { %859 = vmatmul.mubr.bf16.vlgmr.msra.gmra.mrb[0].mxu0 %v324_v24 }
  0x8d   : > { %1339 = vmatprep.mubr.msk.bf16.mxu0 %vm1666_vm0, %v1665_v1  ;;  %1338 = vmatpush3.bf16.msra.mxu0 %v1492_v25  ;;  %v1500_v25 = vld [vmem:[#allocation7 + $0x38] sm:$0xff]  }
  0x8e   : > { %1343 = vmatprep.subr.bf16.mxu0 %v1665_v1 }
  0x94   : > { %1340 = vmatmul.mubr.msk.bf16.vlgmr.msra.gmra.mrb[4].mxu0 %vm445_vm1, %v328_v27 }
  0x95   : > { %1359 = vmatprep.mubr.msk.bf16.mxu0 %vm1666_vm0, %v1665_v1  ;;  %1344 = vmatpush3.bf16.msra.mxu0 %v1493_v14 }
  0x96   : > { %1345 = vmatprep.subr.bf16.mxu0 %v1665_v1 }
  0x99   : > { %1346 = vmatpush3.bf16.msra.mxu0 %v1494_v15 }
  0x9a   : > { %1347 = vmatprep.subr.bf16.mxu0 %v1665_v1 }
  0x9d   : > { %1348 = vmatpush3.bf16.msra.mxu0 %v1495_v16 }
  0x9e   : > { %1349 = vmatprep.subr.bf16.mxu0 %v1665_v1 }
  0xa1   : > { %1350 = vmatpush3.bf16.msra.mxu0 %v1496_v17 }
  0xa2   : > { %1351 = vmatprep.subr.bf16.mxu0 %v1665_v1 }
  0xa5   : > { %1352 = vmatpush3.bf16.msra.mxu0 %v1497_v18 }
  0xa6   : > { %1353 = vmatprep.subr.bf16.mxu0 %v1665_v1 }
  0xa9   : > { %1354 = vmatpush3.bf16.msra.mxu0 %v1498_v19 }
  0xaa   : > { %1355 = vmatprep.subr.bf16.mxu0 %v1665_v1 }
  0xad   : > { %1356 = vmatpush3.bf16.msra.mxu0 %v1499_v22 }
  0xae   : > { %1357 = vmatprep.subr.bf16.mxu0 %v1665_v1 }
  0xb1   : > { %1358 = vmatpush3.bf16.msra.mxu0 %v1500_v25 }
  0xef   : > { %v432_v31 = vpop.permute.xlu0 %431 }
  0xf0   : > { %vm433_vm2 = vcmp.eq.s32.totalorder %v428_v29, %v432_v31 }
  0xf1   : > { %v1186_v32 = vsel %vm433_vm2, 1.0, %v1665_v1 }
  0xf2   : > { %v436_v35 = vpack.c.bf16 %v1186_v32, %v1186_v32 }
  0xf4   : > { %1334 = vmatmul.mubr.msk.bf16.vlgmr.msra.gmra.mrb[0].mxu1 %vm445_vm1, %v436_v35 }
  0xf5   : > { %1255 = vmatpush3.bf16.msra.mxu1 %v1445_v33  ;;  %818 = vmatprep.mubr.bf16.mxu1 %v323_v34 }
  0xf6   : > { %1256 = vmatprep.subr.bf16.mxu1 %v1448_v36 }
  0xf9   : > { %1257 = vmatpush3.bf16.msra.mxu1 %v1449_v37 }
  0xfa   : > { %1258 = vmatprep.subr.bf16.mxu1 %v1452_v38 }
  0xfd   : > { %1259 = vmatpush3.bf16.msra.mxu1 %v1453_v39 }
  0xfe   : > { %1260 = vmatprep.subr.bf16.mxu1 %v1456_v40 }
 0x101   : > { %1261 = vmatpush3.bf16.msra.mxu1 %v1457_v41 }
 0x102   : > { %1262 = vmatprep.subr.bf16.mxu1 %v1460_v42 }
 0x105   : > { %1263 = vmatpush3.bf16.msra.mxu1 %v1461_v43 }
 0x106   : > { %1264 = vmatprep.subr.bf16.mxu1 %v1464_v44 }
 0x109   : > { %1265 = vmatpush3.bf16.msra.mxu1 %v1465_v45  ;;  %v1239_v45 = vld [vmem:[%s1975_s5] ss:$0 sm:$0xff] }
 0x10a   : > { %1266 = vmatprep.subr.bf16.mxu1 %v1468_v46 }
 0x10d   : > { %1267 = vmatpush3.bf16.msra.mxu1 %v1469_v47 }
 0x10e   : > { %1268 = vmatprep.subr.bf16.mxu1 %v1472_v48 }
 0x111   : > { %1269 = vmatpush3.bf16.msra.mxu1 %v1473_v49 }
 0x112   : > { %1298 = vmatprep.subr.bf16.mxu1 %v1476_v51 }
 0x114   : > { %819 = vmatmul.mubr.bf16.vlgmr.msra.gmra.mrb[4].mxu1 %v322_v53 }
 0x115   : > { %1299 = vmatpush3.bf16.msra.mxu1 %v1477_v54  ;;  %898 = vmatprep.mubr.bf16.mxu1 %v327_v55 }
 0x116   : > { %1300 = vmatprep.subr.bf16.mxu1 %v1478_v56 }
 0x119   : > { %1301 = vmatpush3.bf16.msra.mxu1 %v1479_v57 }
 0x11a   : > { %1302 = vmatprep.subr.bf16.mxu1 %v1480_v58 }
 0x11d   : > { %1303 = vmatpush3.bf16.msra.mxu1 %v1481_v59 }
 0x11e   : > { %1304 = vmatprep.subr.bf16.mxu1 %v1482_v60 }
 0x121   : > { %1305 = vmatpush3.bf16.msra.mxu1 %v1483_v61 }
 0x122   : > { %1306 = vmatprep.subr.bf16.mxu1 %v1484_v62 }
 0x125   : > { %1307 = vmatpush3.bf16.msra.mxu1 %v1485_v63 }
 0x126   : > { %1308 = vmatprep.subr.bf16.mxu1 %v1486_v0 }
 0x129   : > { %1309 = vmatpush3.bf16.msra.mxu1 %v1487_v2 }
 0x12a   : > { %1310 = vmatprep.subr.bf16.mxu1 %v1488_v3 }
 0x12d   : > { %1311 = vmatpush3.bf16.msra.mxu1 %v1489_v4 }
 0x12e   : > { %1312 = vmatprep.subr.bf16.mxu1 %v1490_v5 }
 0x131   : > { %1313 = vmatpush3.bf16.msra.mxu1 %v1491_v6 }
 0x134   : > { %899 = vmatmul.mubr.bf16.vlgmr.msra.gmra.mrb[8].mxu1 %v326_v8 }
 0x15f   : > { %v1292_v9 = vpop.f32.mrb[0].mxu0 }
 0x160   : > { %v1293_v10 = vpop.f32.mrb[1].mxu0 }
 0x161   : > { %v1294_v11 = vadd.f32 %v1293_v10, %v1292_v9  ;;  %v1295_v12 = vpop.f32.mrb[2].mxu0 }
 0x162   : > { %v1296_v13 = vpop.f32.mrb[3].mxu0 }
 0x167   : > { %v940_v20 = vpop.f32.mrb[4].mxu0 }
 0x168   : > { %v1341_v21 = vpop.f32.mrb[5].mxu0 }
 0x169   : > { %v943_v23 = vpop.f32.mrb[6].mxu0 }
 0x16a   : > { %v1342_v24 = vpop.f32.mrb[7].mxu0 }
 0x1c7   : > { %v483_v26 = vpop.f32.mrb[0].mxu1 }
 0x1c8   : > { %v1335_v27 = vpop.f32.mrb[1].mxu1 }
 0x1c9   : > { %v486_v28 = vpop.f32.mrb[2].mxu1 }
 0x1ca   : > { %v1336_v29 = vpop.f32.mrb[3].mxu1 }
 0x1e7   : > { %v1270_v30 = vpop.f32.mrb[4].mxu1 }
 0x1e8   : > { %v1271_v31 = vpop.f32.mrb[5].mxu1 }
 0x1e9   : > { %v1272_v32 = vadd.f32 %v1271_v31, %v1270_v30  ;;  %v1273_v33 = vpop.f32.mrb[6].mxu1 }
 0x1ea   : > { %v1274_v34 = vpop.f32.mrb[7].mxu1 }
 0x1eb   : > { %v821_v35 = vadd.f32 %v1272_v32, %v483_v26 }
 0x1ed   : > { %v861_v36 = vadd.f32 %v1294_v11, %v821_v35 }
 0x207   : > { %v1314_v37 = vpop.f32.mrb[8].mxu1 }
 0x208   : > { %v1315_v38 = vpop.f32.mrb[9].mxu1 }
 0x209   : > { %v1316_v39 = vadd.f32 %v1315_v38, %v1314_v37  ;;  %v1317_v40 = vpop.f32.mrb[10].mxu1 }
 0x20a   : > { %v1318_v1 = vpop.f32.mrb[11].mxu1 }
 0x20b   : > { %v901_v41 = vadd.f32 %v1316_v39, %v861_v36 }
 0x20d   : > { %v941_v42 = vadd.f32 %v940_v20, %v901_v41 }
 0x20f   : > { %v946_v43 = vmax.f32 %v941_v42, 0.0 }
 0x211   : > { %v947_v44 = vpack.c.bf16 %v946_v43, %v946_v43 }
 0x213   : > { %1360 = vmatmul.mubr.bf16.vlgmr.msra.gmra.mrb[8].mxu0 %v947_v44 }
 0x2e6   : > { %v1053_v46 = vpop.f32.mrb[8].mxu0 }
 0x2e7   : > { %v1054_v47 = vadd.f32 %v1239_v45, %v1053_v46  ;;  %v1361_v48 = vpop.f32.mrb[9].mxu0 }
 0x2e8   : > { %v1056_v49 = vpop.f32.mrb[10].mxu0 }
 0x2e9   : > { %1059 = vst [vmem:[%s309_s30] sm:$0xff] %v1054_v47  ;;  %v1362_v50 = vpop.f32.mrb[11].mxu0 }
 0x2ea   : > { %1600 = shalt.err (!%p1597_p13)
}
 0x2eb   : > { %s1601_s18 = scalar_lea.hbm %s1926_s19, 128  ;;  %s1605_s13 = scalar_lea.hbm %s1976_s6, 256 }
 0x2ec   : > { %p1602_p6 = scmp.ne.s32.totalorder %s1926_s19, %s1601_s18  ;;  %p1606_p5 = scmp.lt.u32.totalorder %s1926_s19, %s1976_s6 }
 0x2ed   : > { %p1607_p8 = scmp.lt.u32.totalorder %s1605_s13, %s1601_s18  ;;  %p1609_p0 = scmp.lt.u32.totalorder %s1601_s18, %s1926_s19 }
 0x2ee   : > { %p1603_p10 = pnand %p1602_p6, %p1990_p1 }
 0x2ef   : > { %p1608_p11 = por %p1607_p8, %p1606_p5 }
 0x2f0   : > { %p1604_p4 = pneg %p1603_p10 }
 0x2f1   : > { %p1610_p3 = por %p1609_p0, %p1608_p11 }
 0x2f3   : > { %p1611_p7 = pnand %p1610_p3, %p1604_p4 }
 0x2f5   : > { %1614 = shalt.err (!%p1611_p7)
}
 0x2f6   : > { %1380 = dma.vmem_to_hbm [thread:$0]  (%p1990_p1), %s1928_s10, 128, %s1926_s19, %s1061_s15  }
 0x2f7 PF: > { %s1086_s30 = sand.u32 1, %s1645_s21   ;;  %p1991_p9 = scmp.ne.s32.totalorder %s1981_s28, 0 }
 0x2f8   : > { %p1992_p12 = scmp.ge.s32.totalorder %s1657_s24, 2  ;;  %s1087_s20 = scalar_lea.sflag [#allocation4], %s1086_s30 }
 0x2fa   : > { %p1394_p2 = pnand %p1992_p12, %p1991_p9 }
 0x2fc   : > { %1640 = dma.done.wait (!%p1394_p2), %s1087_s20, 128  }
 0x2fd   : > { %1642 = vsyncadd (!%p1394_p2), %s1087_s20, 4294967168  ;;  %p20_p13 = scmp.ge.s32.totalorder %s1813_s26, 4   ;;  %s1993_s21 = smov %s1649_s22 }
 0x2fe   : > { %s1994_s22 = smov %s1653_s23  ;;  %s1995_s23 = smov %s1829_s11 }
 0x2ff   : > { %s1996_s24 = smov %s1813_s26  ;;  %22 = sbr.rel (!%p20_p13) target bundleno = 6 (0x6), region = 100 }
 0x306   :  { %1092 = vsyncpa [#allocation3], 1 }
 0x307   :  { %1094 = vsyncpa [#allocation3 + $0x1], 1 }
 0x308   :  { %1095 = vsyncpa [#allocation6], 1 }
 0x309   :  { %1096 = vsyncpa [#allocation4], 1 }
 0x30a   :  { %1098 = vsyncpa [#allocation4 + $0x1], 1 }

</bundles_post_ra>
